<compile_context>
chip_gen: v5e
topology: v5e:2x2
jax: 0.10.0
libtpu: 0.0.40
codegen_flags: <defaults>
</compile_context>

<pallas_src>
import functools

import jax
import jax.numpy as jnp
from jax.experimental import pallas as pl
from jax.experimental.pallas import tpu as pltpu


def _round_up(n, m):
    return ((n + m - 1) // m) * m


def sdmlp_kernel(x_ref, w1_ref, b1_ref, w2_ref, b2_ref, o_ref):
    # First linear: [TM, ind_p](bf16) @ [ind_p, odim_p](bf16) -> f32 acc.
    h = jnp.dot(x_ref[...], w1_ref[...], preferred_element_type=jnp.float32)
    h = h + b1_ref[...]                      # bias in f32, broadcast over rows
    # LeakyReLU(negative_slope=0.2) on the VPU (free under the MXU stream).
    h = jnp.where(h > 0, h, 0.2 * h)
    # Dropout: identity (eval mode).
    # Second linear: [TM, odim_p](bf16) @ [odim_p, odim_p](bf16) -> f32 acc.
    y = jnp.dot(h.astype(w2_ref.dtype), w2_ref[...],
                preferred_element_type=jnp.float32)
    y = y + b2_ref[...]
    o_ref[...] = y.astype(o_ref.dtype)


@functools.partial(jax.jit, static_argnames=("block_m",))
def sdmlp_forward(x, w1, b1, w2, b2, *, block_m=512):
    """x: [B, ind], w1: [ind, odim], b1: [odim], w2: [odim, odim], b2: [odim].

    Weights are stored pre-transposed vs. PyTorch nn.Linear (x @ w layout).
    """
    B, ind = x.shape
    odim = w1.shape[1]
    out_dtype = x.dtype
    compute_dtype = jnp.bfloat16

    # --- Pad to TPU-friendly shapes (exact: zero padding contributes 0). ---
    ind_p = _round_up(ind, 128)
    odim_p = _round_up(odim, 128)
    if B <= block_m:
        tm = _round_up(B, 8)
        b_p = tm
    else:
        tm = block_m
        b_p = _round_up(B, tm)

    x_p = jnp.pad(x, ((0, b_p - B), (0, ind_p - ind))).astype(compute_dtype)
    w1_p = jnp.pad(w1, ((0, ind_p - ind), (0, odim_p - odim))).astype(compute_dtype)
    w2_p = jnp.pad(w2, ((0, odim_p - odim), (0, odim_p - odim))).astype(compute_dtype)
    b1_p = jnp.pad(b1, (0, odim_p - odim)).astype(jnp.float32).reshape(1, odim_p)
    b2_p = jnp.pad(b2, (0, odim_p - odim)).astype(jnp.float32).reshape(1, odim_p)

    n_steps = b_p // tm

    # --- Advisory cost + VMEM budget. ---
    flops = 2 * b_p * odim_p * (ind_p + odim_p)
    bytes_accessed = (x_p.size * 2 + w1_p.size * 2 + w2_p.size * 2
                      + b1_p.size * 4 + b2_p.size * 4
                      + b_p * odim_p * jnp.dtype(out_dtype).itemsize)
    cost = pl.CostEstimate(flops=flops, transcendentals=0,
                           bytes_accessed=bytes_accessed)

    # Working set: resident weights + double-buffered activation tiles.
    working_set = (w1_p.size * 2 + w2_p.size * 2
                   + 2 * tm * ind_p * 2
                   + 2 * tm * odim_p * jnp.dtype(out_dtype).itemsize
                   + 2 * odim_p * 4)
    vmem_limit = min(max(2 * working_set + (4 << 20), 16 << 20), 48 << 20)

    out_p = pl.pallas_call(
        sdmlp_kernel,
        out_shape=jax.ShapeDtypeStruct((b_p, odim_p), out_dtype),
        grid_spec=pltpu.PrefetchScalarGridSpec(
            num_scalar_prefetch=0,
            grid=(n_steps,),
            in_specs=[
                # Activations step with the batch grid (double-buffered DMA).
                pl.BlockSpec((tm, ind_p), lambda i: (i, 0)),
                # Weights / biases: constant block index -> VMEM-resident.
                pl.BlockSpec((ind_p, odim_p), lambda i: (0, 0)),
                pl.BlockSpec((1, odim_p), lambda i: (0, 0)),
                pl.BlockSpec((odim_p, odim_p), lambda i: (0, 0)),
                pl.BlockSpec((1, odim_p), lambda i: (0, 0)),
            ],
            out_specs=pl.BlockSpec((tm, odim_p), lambda i: (i, 0)),
        ),
        compiler_params=pltpu.CompilerParams(
            dimension_semantics=("parallel",),
            vmem_limit_bytes=int(vmem_limit),
        ),
        cost_estimate=cost,
    )(x_p, w1_p, b1_p, w2_p, b2_p)

    # Slice padding back off.
    return out_p[:B, :odim]


def init_params(key, ind, odim, dtype=jnp.float32):
    """Deterministic PyTorch-style (uniform +/- 1/sqrt(fan_in)) init."""
    k1, k2, k3, k4 = jax.random.split(key, 4)
    lim1 = 1.0 / (ind ** 0.5)
    lim2 = 1.0 / (odim ** 0.5)
    w1 = jax.random.uniform(k1, (ind, odim), dtype, -lim1, lim1)
    b1 = jax.random.uniform(k2, (odim,), dtype, -lim1, lim1)
    w2 = jax.random.uniform(k3, (odim, odim), dtype, -lim2, lim2)
    b2 = jax.random.uniform(k4, (odim,), dtype, -lim2, lim2)
    return w1, b1, w2, b2


def reference_forward(x, w1, b1, w2, b2):
    """JAX reference mirroring the kernel's bf16-operand / f32-accum path."""
    cd = jnp.bfloat16
    h = jnp.dot(x.astype(cd), w1.astype(cd),
                preferred_element_type=jnp.float32) + b1.astype(jnp.float32)
    h = jnp.where(h > 0, h, 0.2 * h)
    y = jnp.dot(h.astype(cd), w2.astype(cd),
                preferred_element_type=jnp.float32) + b2.astype(jnp.float32)
    return y.astype(x.dtype)


if __name__ == "__main__":
    key = jax.random.PRNGKey(0)
    kx, kp = jax.random.split(key)

    B, ind, odim = 16, 32, 32
    x = jax.random.normal(kx, (B, ind), jnp.float32)
    w1, b1, w2, b2 = init_params(kp, ind, odim)

    out = sdmlp_forward(x, w1, b1, w2, b2)
    out = jax.block_until_ready(out)

    ref = reference_forward(x, w1, b1, w2, b2)
    assert out.shape == (B, odim)
    assert jnp.allclose(out, ref, atol=1e-2, rtol=1e-2), (
        float(jnp.max(jnp.abs(out - ref))))

    print("KERNEL_OK")
</pallas_src>

<mosaic_0001>
module attributes {stable_mosaic.version = 11 : i64} {
  func.func @sdmlp_kernel(%arg0: i32, %arg1: memref<16x128xbf16, #tpu.memory_space<vmem>>, %arg2: memref<128x128xbf16, #tpu.memory_space<vmem>>, %arg3: memref<1x128xf32, #tpu.memory_space<vmem>>, %arg4: memref<128x128xbf16, #tpu.memory_space<vmem>>, %arg5: memref<1x128xf32, #tpu.memory_space<vmem>>, %arg6: memref<16x128xf32, #tpu.memory_space<vmem>>) attributes {dimension_semantics = [#tpu.dimension_semantics<parallel>], iteration_bounds = array<i64: 1>, scalar_prefetch = 0 : i64, scratch_operands = 0 : i64, tpu.core_type = #tpu.core_type<tc>, window_params = [{transform_indices = @transform_0, window_bounds = array<i64: 16, 128>}, {pipeline_mode = #tpu.pipeline_mode<synchronous>, transform_indices = @transform_1, window_bounds = array<i64: 128, 128>}, {pipeline_mode = #tpu.pipeline_mode<synchronous>, transform_indices = @transform_2, window_bounds = array<i64: 1, 128>}, {pipeline_mode = #tpu.pipeline_mode<synchronous>, transform_indices = @transform_3, window_bounds = array<i64: 128, 128>}, {pipeline_mode = #tpu.pipeline_mode<synchronous>, transform_indices = @transform_4, window_bounds = array<i64: 1, 128>}, {transform_indices = @transform_5, window_bounds = array<i64: 16, 128>}]} {
    %c0 = arith.constant 0 : index
    %c0_0 = arith.constant 0 : index
    %0 = vector.load %arg1[%c0, %c0_0] : memref<16x128xbf16, #tpu.memory_space<vmem>>, vector<16x128xbf16>
    %c0_1 = arith.constant 0 : index
    %c0_2 = arith.constant 0 : index
    %1 = vector.load %arg2[%c0_1, %c0_2] : memref<128x128xbf16, #tpu.memory_space<vmem>>, vector<128x128xbf16>
    %cst = arith.constant dense<0.000000e+00> : vector<16x128xf32>
    %2 = tpu.matmul %0, %1, %cst {dimension_numbers = #tpu.dot_dimension_numbers<[1], [0], [0], [1], [0, 0, 1, 1], [], []>} : vector<16x128xbf16>, vector<128x128xbf16>, vector<16x128xf32> -> vector<16x128xf32>
    %c0_3 = arith.constant 0 : index
    %c0_4 = arith.constant 0 : index
    %3 = vector.load %arg3[%c0_3, %c0_4] : memref<1x128xf32, #tpu.memory_space<vmem>>, vector<1x128xf32>
    %4 = vector.broadcast %3 : vector<1x128xf32> to vector<16x128xf32>
    %5 = arith.addf %2, %4 : vector<16x128xf32>
    %cst_5 = arith.constant 0.000000e+00 : f32
    %6 = vector.broadcast %cst_5 : f32 to vector<16x128xf32>
    %7 = arith.cmpf ogt, %5, %6 : vector<16x128xf32>
    %cst_6 = arith.constant 2.000000e-01 : f32
    %8 = vector.broadcast %cst_6 : f32 to vector<16x128xf32>
    %9 = arith.mulf %8, %5 : vector<16x128xf32>
    %10 = arith.select %7, %5, %9 : vector<16x128xi1>, vector<16x128xf32>
    %11 = arith.truncf %10 : vector<16x128xf32> to vector<16x128xbf16>
    %c0_7 = arith.constant 0 : index
    %c0_8 = arith.constant 0 : index
    %12 = vector.load %arg4[%c0_7, %c0_8] : memref<128x128xbf16, #tpu.memory_space<vmem>>, vector<128x128xbf16>
    %cst_9 = arith.constant dense<0.000000e+00> : vector<16x128xf32>
    %13 = tpu.matmul %11, %12, %cst_9 {dimension_numbers = #tpu.dot_dimension_numbers<[1], [0], [0], [1], [0, 0, 1, 1], [], []>} : vector<16x128xbf16>, vector<128x128xbf16>, vector<16x128xf32> -> vector<16x128xf32>
    %c0_10 = arith.constant 0 : index
    %c0_11 = arith.constant 0 : index
    %14 = vector.load %arg5[%c0_10, %c0_11] : memref<1x128xf32, #tpu.memory_space<vmem>>, vector<1x128xf32>
    %15 = vector.broadcast %14 : vector<1x128xf32> to vector<16x128xf32>
    %16 = arith.addf %13, %15 : vector<16x128xf32>
    %c0_12 = arith.constant 0 : index
    %c0_13 = arith.constant 0 : index
    %17 = vector.load %arg6[%c0_12, %c0_13] : memref<16x128xf32, #tpu.memory_space<vmem>>, vector<16x128xf32>
    tpu.vector_store %arg6[%c0_12, %c0_13], %16 {strides = array<i32>} : memref<16x128xf32, #tpu.memory_space<vmem>>, vector<16x128xf32>,
    return
  }
  func.func @transform_0(%arg0: i32) -> (i32, i32) {
    %c0_i32 = arith.constant 0 : i32
    %c0_i32_0 = arith.constant 0 : i32
    return %arg0, %c0_i32 : i32, i32
  }
  func.func @transform_1(%arg0: i32) -> (i32, i32) {
    %c0_i32 = arith.constant 0 : i32
    %c0_i32_0 = arith.constant 0 : i32
    %c0_i32_1 = arith.constant 0 : i32
    return %c0_i32, %c0_i32_0 : i32, i32
  }
  func.func @transform_2(%arg0: i32) -> (i32, i32) {
    %c0_i32 = arith.constant 0 : i32
    %c0_i32_0 = arith.constant 0 : i32
    %c0_i32_1 = arith.constant 0 : i32
    return %c0_i32, %c0_i32_0 : i32, i32
  }
  func.func @transform_3(%arg0: i32) -> (i32, i32) {
    %c0_i32 = arith.constant 0 : i32
    %c0_i32_0 = arith.constant 0 : i32
    %c0_i32_1 = arith.constant 0 : i32
    return %c0_i32, %c0_i32_0 : i32, i32
  }
  func.func @transform_4(%arg0: i32) -> (i32, i32) {
    %c0_i32 = arith.constant 0 : i32
    %c0_i32_0 = arith.constant 0 : i32
    %c0_i32_1 = arith.constant 0 : i32
    return %c0_i32, %c0_i32_0 : i32, i32
  }
  func.func @transform_5(%arg0: i32) -> (i32, i32) {
    %c0_i32 = arith.constant 0 : i32
    %c0_i32_0 = arith.constant 0 : i32
    return %arg0, %c0_i32 : i32, i32
  }
}

</mosaic_0001>

<bundles_post_ra>
// kernel: sdmlp_forward.1
= control target key start
LH: loop header
LB: loop body
LE: loop exit
PB: predicated region body
PF: predicated region fallthrough
CT: control target
= control target key end

     0   :  { %s429_s0 = inlined_call_operand.vmem [shape: bf16[16,128], index: 0, kind: input, shape index: {}]   ;;  %s430_s1 = inlined_call_operand.vmem [shape: bf16[128,128], index: 1, kind: input, shape index: {}]   ;;  %s431_s2 = inlined_call_operand.vmem [shape: f32[1,128], index: 2, kind: input, shape index: {}]   ;;  %s432_s3 = inlined_call_operand.vmem [shape: bf16[128,128], index: 3, kind: input, shape index: {}]   ;;  %s433_s4 = inlined_call_operand.vmem [shape: f32[1,128], index: 4, kind: input, shape index: {}]   ;;  %s434_s5 = inlined_call_operand.hbm [shape: f32[16,128], index: 5, kind: output, shape index: {}]  }
   0x1   :  { %v296_v0 = vld [vmem:[%s430_s1 + $0x38] sm:$0xff]  ;;  %v295_v1 = vld [vmem:[%s430_s1 + $0x30] sm:$0xff] }
   0x2   :  { %97 = vmatpush.bf16.msra.mxu0 %v296_v0  ;;  %v304_v2 = vld [vmem:[%s432_s3 + $0x38] sm:$0xff]  ;;  %v303_v3 = vld [vmem:[%s432_s3 + $0x30] sm:$0xff] }
   0x3   :  { %186 = vmatpush.bf16.msra.mxu1 %v304_v2 }
   0x4   :  { %10 = vsyncpa [#allocation3], 0  ;;  %v294_v4 = vld [vmem:[%s430_s1 + $0x28] sm:$0xff]  ;;  %v293_v6 = vld [vmem:[%s430_s1 + $0x20] sm:$0xff]  ;;  %s208_s6 = sshll.u32 %s434_s5, 4  ;;  %s337_s7 = smov 128   ;;  %s209_s6 = int_to_ptr.hbm [resolvable:$true] %s208_s6 }
   0x5   :  { %v302_v5 = vld [vmem:[%s432_s3 + $0x28] sm:$0xff]  ;;  %v301_v7 = vld [vmem:[%s432_s3 + $0x20] sm:$0xff]  ;;  %v292_v8 = vld [vmem:[%s430_s1 + $0x18] sm:$0xff]  ;;  %s338_s8 = smov 8  }
   0x6   :  { %98 = vmatpush.bf16.msra.mxu0 %v295_v1  ;;  %v291_v9 = vld [vmem:[%s430_s1 + $0x10] sm:$0xff]  ;;  %v290_v10 = vld [vmem:[%s430_s1 + $0x8] sm:$0xff]  ;;  %v289_v11 = vld [vmem:[%s430_s1] sm:$0xff] }
   0x7   :  { %187 = vmatpush.bf16.msra.mxu1 %v303_v3  ;;  %v288_v12 = vld [vmem:[%s429_s0] sm:$0xff]  ;;  %v300_v13 = vld [vmem:[%s432_s3 + $0x18] sm:$0xff]  ;;  %v299_v14 = vld [vmem:[%s432_s3 + $0x10] sm:$0xff] }
   0x8   :  { %v298_v15 = vld [vmem:[%s432_s3 + $0x8] sm:$0xff]  ;;  %v297_v16 = vld [vmem:[%s432_s3] sm:$0xff]  ;;  %s336_s3 = smov [#allocation2]  }
   0x9   :  { %v308_v18 = vld [vmem:[%s431_s2] ss:$0 sm:$0xff]  ;;  %s206_s2 = sshll.u32 %s336_s3, 4  ;;  %s207_s2 = int_to_ptr.vmem [resolvable:$true] %s206_s2 }
   0xa   :  { %99 = vmatpush.bf16.msra.mxu0 %v294_v4  ;;  %v309_v27 = vld [vmem:[%s433_s4] ss:$0 sm:$0xff] }
   0xb   :  { %188 = vmatpush.bf16.msra.mxu1 %v302_v5 }
   0xe   :  { %100 = vmatpush.bf16.msra.mxu0 %v293_v6 }
   0xf   :  { %189 = vmatpush.bf16.msra.mxu1 %v301_v7 }
  0x12   :  { %101 = vmatpush.bf16.msra.mxu0 %v292_v8 }
  0x13   :  { %190 = vmatpush.bf16.msra.mxu1 %v300_v13 }
  0x16   :  { %102 = vmatpush.bf16.msra.mxu0 %v291_v9 }
  0x17   :  { %191 = vmatpush.bf16.msra.mxu1 %v299_v14 }
  0x1a   :  { %103 = vmatpush.bf16.msra.mxu0 %v290_v10 }
  0x1b   :  { %192 = vmatpush.bf16.msra.mxu1 %v298_v15 }
  0x1e   :  { %104 = vmatpush.bf16.msra.mxu0 %v289_v11 }
  0x1f   :  { %193 = vmatpush.bf16.msra.mxu1 %v297_v16 }
  0x21   :  { %105 = vmatmul.bf16.vlgmr.msra.gmra.mxu0 %v288_v12 }
  0x9e   :  { %v106_v17 = vpop.f32.mrf.mxu0 }
  0x9f   :  { %v107_v19 = vadd.f32 %v308_v18, %v106_v17 }
  0xa1   :  { %v113_v21 = vmul.f32 0.2, %v107_v19  ;;  %vm111_vm0 = vcmp.gt.f32.partialorder %v107_v19, 0.0 }
  0xa3   :  { %v115_v24 = vsel %vm111_vm0, %v107_v19, %v113_v21 }
  0xa6   :  { %v108_v20 = vpop.f32.mrf.mxu0 }
  0xa7   :  { %v109_v22 = vadd.f32 %v308_v18, %v108_v20 }
  0xa9   :  { %v114_v23 = vmul.f32 0.2, %v109_v22  ;;  %vm112_vm1 = vcmp.gt.f32.partialorder %v109_v22, 0.0 }
  0xab   :  { %v116_v25 = vsel %vm112_vm1, %v109_v22, %v114_v23 }
  0xac   :  { %v117_v26 = vpack.c.bf16 %v116_v25, %v115_v24 }
  0xae   :  { %194 = vmatmul.bf16.vlgmr.msra.gmra.mxu1 %v117_v26 }
 0x12b   :  { %v195_v28 = vpop.f32.mrf.mxu1 }
 0x12c   :  { %v196_v29 = vadd.f32 %v309_v27, %v195_v28 }
 0x12e   :  { %200 = vst [vmem:[#allocation2] sm:$0xff] %v196_v29 }
 0x133   :  { %v197_v30 = vpop.f32.mrf.mxu1 }
 0x134   :  { %v198_v31 = vadd.f32 %v309_v27, %v197_v30 }
 0x136   :  { %201 = vst [vmem:[#allocation2 + $0x8] sm:$0xff] %v198_v31 }
 0x137   :  { %214 = dma.vmem_to_hbm [thread:$0]  %s207_s2, 256, %s209_s6, [#allocation3], %s337_s7, %s337_s7, %s338_s8  }
 0x138   :  { %334 = dma.done.wait [#allocation3], 256  }
 0x139   :  { %335 = vsyncadd [#allocation3], 4294967040 }
 0x13a   :  { %219 = vsyncpa [#allocation3], 1 }

</bundles_post_ra>
